<compile_context>
chip_gen: v7x
topology: tpu7x:2x2x1
jax: 0.10.0
libtpu: 0.0.40
codegen_flags: <defaults>
</compile_context>

<pallas_src>
import functools

import jax
import jax.numpy as jnp
from jax.experimental import pallas as pl
from jax.experimental.pallas import tpu as pltpu

LANES = 128


# --------------------------------- kernel ------------------------------------
def linreg_kernel(w_ref, ylen_ref, mean_ref, std_ref, *, mean_order, std_order):
    """w_ref: SMEM f32[mean_order + 1 + std_order + 1] =
              [w_m1..w_m{mean_order}, b_mean, w_s1..w_s{std_order}, b_std]
       ylen_ref / mean_ref / std_ref: VMEM (TILE_R, 128) f32."""
    l = ylen_ref[...]                                        # (TILE_R, 128)

    # mean head: Horner over w_m{order}..w_m1, then + b_mean (pure VPU FMAs).
    acc = jnp.full_like(l, w_ref[mean_order - 1])
    for k in range(mean_order - 2, -1, -1):                  # statically unrolled
        acc = acc * l + w_ref[k]
    mean_ref[...] = acc * l + w_ref[mean_order]

    # std head: same Horner, then softplus(threshold=20) on this output only.
    off = mean_order + 1
    acc = jnp.full_like(l, w_ref[off + std_order - 1])
    for k in range(std_order - 2, -1, -1):
        acc = acc * l + w_ref[off + k]
    z = acc * l + w_ref[off + std_order]
    # torch softplus(threshold=20): x if x > 20 else log1p(exp(x)); clamp keeps
    # the exp overflow-safe in f32.
    std_ref[...] = jnp.where(z > 20.0, z, jnp.log1p(jnp.exp(jnp.minimum(z, 20.0))))


# ------------------------------ pallas wrapper --------------------------------
def linear_regression_forward(w_vec, ylen_2d, *, tile_r, mean_order, std_order):
    """w_vec: f32[(mean_order+1)+(std_order+1)] scalar weights (lives in SMEM).
    ylen_2d: f32[R_pad, 128] dense y_len slab, R_pad % tile_r == 0.
    Returns (mean_2d, std_2d), each f32[R_pad, 128]."""
    r_pad, lanes = ylen_2d.shape
    assert lanes == LANES and r_pad % tile_r == 0 and tile_r % 8 == 0
    kernel = functools.partial(
        linreg_kernel, mean_order=mean_order, std_order=std_order)
    out_struct = jax.ShapeDtypeStruct((r_pad, LANES), jnp.float32)
    return pl.pallas_call(
        kernel,
        out_shape=(out_struct, out_struct),
        grid_spec=pltpu.PrefetchScalarGridSpec(
            num_scalar_prefetch=0,
            grid=(r_pad // tile_r,),
            in_specs=[
                # tiny scalar weight vector -> SMEM, no pipelined VMEM stream
                pl.BlockSpec(memory_space=pltpu.MemorySpace.SMEM),
                # dense (tile_r, 128) y_len tile, (8,128)-aligned
                pl.BlockSpec((tile_r, LANES), lambda i: (i, 0)),
            ],
            out_specs=[
                pl.BlockSpec((tile_r, LANES), lambda i: (i, 0)),   # mean_hat
                pl.BlockSpec((tile_r, LANES), lambda i: (i, 0)),   # softplus(std_hat)
            ],
        ),
        compiler_params=pltpu.CompilerParams(
            dimension_semantics=("parallel",)),
    )(w_vec, ylen_2d)


# ------------------------------ host-side glue --------------------------------
def pack_ylens(y_lens, tile_r):
    """Pack y_len values into a dense, zero-padded (R_pad, 128) f32 slab."""
    b = len(y_lens)
    rows = pl.cdiv(max(b, 1), LANES)
    r_pad = tile_r * pl.cdiv(rows, tile_r)
    flat = jnp.zeros((r_pad * LANES,), jnp.float32)
    flat = flat.at[:b].set(jnp.asarray(y_lens, jnp.float32))
    return flat.reshape(r_pad, LANES)


def model_forward(X, Y, params, *, mean_order, std_order, force_kernel=False):
    """Mirrors LinearRegressionModel.forward(X, Y, device)."""
    del X  # unused by the module's forward (only Y drives the features)
    y_lens = [float(len(y.strip().split())) for y in Y]
    b = len(y_lens)
    mean_w, mean_b, std_w, std_b = params

    # Small-batch fast path: the kernel is pure launch/DMA overhead here.
    if b < 256 and not force_kernel:
        yl = jnp.asarray(y_lens, jnp.float32)
        mf = jnp.stack([yl ** (i + 1) for i in range(mean_order)], axis=1)
        sf = jnp.stack([yl ** (i + 1) for i in range(std_order)], axis=1)
        m = mf @ mean_w.T + mean_b
        z = sf @ std_w.T + std_b
        s = jnp.where(z > 20.0, z, jnp.log1p(jnp.exp(jnp.minimum(z, 20.0))))
        return m, s

    # Scalar weight vector: [W_mean, b_mean, W_std, b_std].
    w_vec = jnp.concatenate(
        [mean_w[0], mean_b[0], std_w[0], std_b[0]]).astype(jnp.float32)

    rows = pl.cdiv(b, LANES)
    tile_r = min(512, 8 * pl.cdiv(rows, 8))      # multiple of 8, capped at 512
    ylen_2d = pack_ylens(y_lens, tile_r)

    mean_2d, std_2d = linear_regression_forward(
        w_vec, ylen_2d, tile_r=tile_r, mean_order=mean_order, std_order=std_order)

    # Row-major unpack; padded slots (softplus(b_std)=ln2 on std) are dropped.
    mean_hat = mean_2d.reshape(-1)[:b].reshape(b, 1)
    std_hat = std_2d.reshape(-1)[:b].reshape(b, 1)
    return mean_hat, std_hat


# --------------------------------- driver --------------------------------------
if __name__ == "__main__":
    mean_order = 4
    std_order = 3

    # weights_init_uniform: weight ~ U(0.1, 1.0), bias = 0.
    key = jax.random.PRNGKey(0)
    k_mean, k_std = jax.random.split(key)
    mean_w = jax.random.uniform(k_mean, (1, mean_order), jnp.float32, 0.1, 1.0)
    std_w = jax.random.uniform(k_std, (1, std_order), jnp.float32, 0.1, 1.0)
    mean_b = jnp.zeros((1, 1), jnp.float32)
    std_b = jnp.zeros((1, 1), jnp.float32)
    params = (mean_w, mean_b, std_w, std_b)

    # X is unused by forward(); Y drives the features.
    X = ["src sentence one", "src sentence two", "src three", "src four"]
    Y = [
        "the quick brown fox jumps",
        "hello world",
        "a b c d e f g",
        "single",
    ]
    batch = len(Y)

    # force_kernel=True so the Pallas path is exercised even at this tiny batch
    # (in production the small-batch fast path above would be taken instead).
    mean_hat, std_hat = model_forward(
        X, Y, params, mean_order=mean_order, std_order=std_order, force_kernel=True)
    jax.block_until_ready((mean_hat, std_hat))

    # Pure-JAX reference (mirrors the PyTorch module exactly).
    y_lens = jnp.asarray([len(y.strip().split()) for y in Y], jnp.float32)
    mean_feats = jnp.stack([y_lens ** (i + 1) for i in range(mean_order)], axis=1)
    std_feats = jnp.stack([y_lens ** (i + 1) for i in range(std_order)], axis=1)
    ref_mean = mean_feats @ mean_w.T + mean_b
    ref_lin = std_feats @ std_w.T + std_b
    ref_std = jnp.where(ref_lin > 20.0, ref_lin,
                        jnp.log1p(jnp.exp(jnp.minimum(ref_lin, 20.0))))
    assert jnp.allclose(mean_hat, ref_mean, rtol=1e-5, atol=1e-5)
    assert jnp.allclose(std_hat, ref_std, rtol=1e-5, atol=1e-5)

    print("KERNEL_OK")
</pallas_src>

<mosaic_0001>
module attributes {stable_mosaic.version = 11 : i64} {
  func.func @linreg_kernel(%arg0: i32, %arg1: memref<9xf32, #tpu.memory_space<smem>>, %arg2: memref<8x128xf32, #tpu.memory_space<vmem>>, %arg3: memref<8x128xf32, #tpu.memory_space<vmem>>, %arg4: memref<8x128xf32, #tpu.memory_space<vmem>>) attributes {dimension_semantics = [#tpu.dimension_semantics<parallel>], iteration_bounds = array<i64: 1>, scalar_prefetch = 0 : i64, scratch_operands = 0 : i64, tpu.core_type = #tpu.core_type<tc>, window_params = [{transform_indices = @transform_0, window_bounds = array<i64: 9>}, {transform_indices = @transform_1, window_bounds = array<i64: 8, 128>}, {transform_indices = @transform_2, window_bounds = array<i64: 8, 128>}, {transform_indices = @transform_3, window_bounds = array<i64: 8, 128>}]} {
    %c0 = arith.constant 0 : index
    %c0_0 = arith.constant 0 : index
    %0 = vector.load %arg2[%c0, %c0_0] : memref<8x128xf32, #tpu.memory_space<vmem>>, vector<8x128xf32>
    %c3 = arith.constant 3 : index
    %1 = memref.load %arg1[%c3] : memref<9xf32, #tpu.memory_space<smem>>
    %2 = vector.broadcast %1 : f32 to vector<8x128xf32>
    %3 = arith.mulf %2, %0 : vector<8x128xf32>
    %c2 = arith.constant 2 : index
    %4 = memref.load %arg1[%c2] : memref<9xf32, #tpu.memory_space<smem>>
    %5 = vector.broadcast %4 : f32 to vector<8x128xf32>
    %6 = arith.addf %3, %5 : vector<8x128xf32>
    %7 = arith.mulf %6, %0 : vector<8x128xf32>
    %c1 = arith.constant 1 : index
    %8 = memref.load %arg1[%c1] : memref<9xf32, #tpu.memory_space<smem>>
    %9 = vector.broadcast %8 : f32 to vector<8x128xf32>
    %10 = arith.addf %7, %9 : vector<8x128xf32>
    %11 = arith.mulf %10, %0 : vector<8x128xf32>
    %c0_1 = arith.constant 0 : index
    %12 = memref.load %arg1[%c0_1] : memref<9xf32, #tpu.memory_space<smem>>
    %13 = vector.broadcast %12 : f32 to vector<8x128xf32>
    %14 = arith.addf %11, %13 : vector<8x128xf32>
    %15 = arith.mulf %14, %0 : vector<8x128xf32>
    %c4 = arith.constant 4 : index
    %16 = memref.load %arg1[%c4] : memref<9xf32, #tpu.memory_space<smem>>
    %17 = vector.broadcast %16 : f32 to vector<8x128xf32>
    %18 = arith.addf %15, %17 : vector<8x128xf32>
    %c0_2 = arith.constant 0 : index
    %c0_3 = arith.constant 0 : index
    %19 = vector.load %arg3[%c0_2, %c0_3] : memref<8x128xf32, #tpu.memory_space<vmem>>, vector<8x128xf32>
    tpu.vector_store %arg3[%c0_2, %c0_3], %18 {strides = array<i32>} : memref<8x128xf32, #tpu.memory_space<vmem>>, vector<8x128xf32>,
    %c7 = arith.constant 7 : index
    %20 = memref.load %arg1[%c7] : memref<9xf32, #tpu.memory_space<smem>>
    %21 = vector.broadcast %20 : f32 to vector<8x128xf32>
    %22 = arith.mulf %21, %0 : vector<8x128xf32>
    %c6 = arith.constant 6 : index
    %23 = memref.load %arg1[%c6] : memref<9xf32, #tpu.memory_space<smem>>
    %24 = vector.broadcast %23 : f32 to vector<8x128xf32>
    %25 = arith.addf %22, %24 : vector<8x128xf32>
    %26 = arith.mulf %25, %0 : vector<8x128xf32>
    %c5 = arith.constant 5 : index
    %27 = memref.load %arg1[%c5] : memref<9xf32, #tpu.memory_space<smem>>
    %28 = vector.broadcast %27 : f32 to vector<8x128xf32>
    %29 = arith.addf %26, %28 : vector<8x128xf32>
    %30 = arith.mulf %29, %0 : vector<8x128xf32>
    %c8 = arith.constant 8 : index
    %31 = memref.load %arg1[%c8] : memref<9xf32, #tpu.memory_space<smem>>
    %32 = vector.broadcast %31 : f32 to vector<8x128xf32>
    %33 = arith.addf %30, %32 : vector<8x128xf32>
    %cst = arith.constant 2.000000e+01 : f32
    %34 = vector.broadcast %cst : f32 to vector<8x128xf32>
    %35 = arith.cmpf ogt, %33, %34 : vector<8x128xf32>
    %cst_4 = arith.constant 2.000000e+01 : f32
    %36 = vector.broadcast %cst_4 : f32 to vector<8x128xf32>
    %37 = arith.minimumf %33, %36 : vector<8x128xf32>
    %38 = math.exp %37 : vector<8x128xf32>
    %39 = math.log1p %38 : vector<8x128xf32>
    %40 = arith.select %35, %33, %39 : vector<8x128xi1>, vector<8x128xf32>
    %c0_5 = arith.constant 0 : index
    %c0_6 = arith.constant 0 : index
    %41 = vector.load %arg4[%c0_5, %c0_6] : memref<8x128xf32, #tpu.memory_space<vmem>>, vector<8x128xf32>
    tpu.vector_store %arg4[%c0_5, %c0_6], %40 {strides = array<i32>} : memref<8x128xf32, #tpu.memory_space<vmem>>, vector<8x128xf32>,
    return
  }
  func.func @transform_0(%arg0: i32) -> i32 {
    %c0_i32 = arith.constant 0 : i32
    %c0_i32_0 = arith.constant 0 : i32
    return %c0_i32 : i32
  }
  func.func @transform_1(%arg0: i32) -> (i32, i32) {
    %c0_i32 = arith.constant 0 : i32
    %c0_i32_0 = arith.constant 0 : i32
    return %arg0, %c0_i32 : i32, i32
  }
  func.func @transform_2(%arg0: i32) -> (i32, i32) {
    %c0_i32 = arith.constant 0 : i32
    %c0_i32_0 = arith.constant 0 : i32
    return %arg0, %c0_i32 : i32, i32
  }
  func.func @transform_3(%arg0: i32) -> (i32, i32) {
    %c0_i32 = arith.constant 0 : i32
    %c0_i32_0 = arith.constant 0 : i32
    return %arg0, %c0_i32 : i32, i32
  }
}

</mosaic_0001>

<bundles_post_ra>
// kernel: tpu_custom_call.1
= control target key start
LH: loop header
LB: loop body
LE: loop exit
PB: predicated region body
PF: predicated region fallthrough
CT: control target
= control target key end

     0   :  { %9 = vsyncpa [#allocation5], 0  ;;  %s289_s0 = inlined_call_operand.hbm [shape: f32[9], index: 0, kind: input, shape index: {}]   ;;  %s290_s1 = inlined_call_operand.hbm [shape: f32[8,128], index: 1, kind: input, shape index: {}]   ;;  %s291_s2 = inlined_call_operand.hbm [shape: f32[8,128], index: 2, kind: output, shape index: {0}]   ;;  %s292_s3 = inlined_call_operand.hbm [shape: f32[8,128], index: 3, kind: output, shape index: {1}]  }
   0x1   :  { %10 = vsyncpa [#allocation3], 0 }
   0x2   :  { %11 = vsyncpa [#allocation4], 0 }
   0x3   :  { %12 = vsyncpa [#allocation9], 0  ;;  %s133_s14 = scalar_lea.hbm %s289_s0, 16 }
   0x4   :  { %p134_p0 = scmp.ne.s32.totalorder %s289_s0, %s133_s14  ;;  %p137_p1 = scmp.lt.u32.totalorder %s133_s14, %s289_s0 }
   0x6   :  { %p139_p2 = pnand %p137_p1, %p134_p0 }
   0x8   :  { %142 = shalt.err (!%p139_p2)
}
   0x9   :  { %s217_s19 = smov [#allocation2]   ;;  %s218_s22 = smov [#allocation6]  }
   0xa   :  { %20 = dma.hbm_to_smem %s289_s0, 16, %s217_s19, [#allocation5]  }
   0xb   :  { %s27_s23 = sshll.u32 %s218_s22, 4  ;;  %s143_s26 = scalar_lea.hbm %s290_s1, 128  ;;  %s28_s23 = int_to_ptr.vmem [resolvable:$true] %s27_s23 }
   0xc   :  { %p144_p3 = scmp.ne.s32.totalorder %s290_s1, %s143_s26  ;;  %p147_p4 = scmp.lt.u32.totalorder %s143_s26, %s290_s1 }
   0xe   :  { %p149_p5 = pnand %p147_p4, %p144_p3 }
  0x10   :  { %152 = shalt.err (!%p149_p5)
}
  0x11   :  { %s153_s4 = scalar_lea.vmem %s28_s23, 128  ;;  %p158_p7 = scmp.lt.s32.totalorder %s28_s23, %s28_s23 }
  0x12   :  { %p154_p6 = scmp.ne.s32.totalorder %s28_s23, %s153_s4  ;;  %p159_p8 = scmp.lt.s32.totalorder %s153_s4, %s153_s4 }
  0x14   :  { %p160_p9 = por %p159_p8, %p158_p7 }
  0x16   :  { %p161_p10 = pnand %p160_p9, %p154_p6 }
  0x18   :  { %164 = shalt.err (!%p161_p10)
}
  0x19   :  { %30 = dma.hbm_to_vmem [thread:$0]  %s290_s1, 128, %s28_s23, [#allocation3]  }
  0x1a   :  { %209 = dma.done.wait [#allocation5], 16  }
  0x1b   :  { %210 = vsyncadd [#allocation5], 4294967280 }
  0x1c   :  { %211 = dma.done.wait [#allocation3], 128  }
  0x1d   :  { %212 = vsyncadd [#allocation3], 4294967168 }
  0x1e   :  { %37 = sfence }
  0x1f   :  { %s117_s6 = sld [smem:[#allocation2 + $0x3]]  ;;  %s118_s7 = sld [smem:[#allocation2 + $0x2]]  ;;  %v38_v0 = vld [vmem:[#allocation6] sm:$0xff] }
  0x20   :  { %s119_s8 = sld [smem:[#allocation2 + $0x1]]  ;;  %s121_s9 = sld [smem:[#allocation2 + $0x7]] }
  0x21   :  { %s122_s10 = sld [smem:[#allocation2 + $0x6]]  ;;  %s123_s11 = sld [smem:[#allocation2 + $0x5]] }
  0x22   :  { %s50_s12 = sld [smem:[#allocation2]]  ;;  %s120_s1 = sld [smem:[#allocation2 + $0x4]] }
  0x23   :  { %s124_s13 = sld [smem:[#allocation2 + $0x8]]  ;;  %s219_s14 = smov [#allocation7]  }
  0x24   :  { %s93_s15 = sshll.u32 %s219_s14, 4  ;;  %s94_s15 = int_to_ptr.vmem [resolvable:$true] %s93_s15 }
  0x25   :  { %v40_v1 = vstv %s117_s6  ;;  %v43_v2 = vstv %s118_s7  ;;  %s165_s16 = scalar_lea.vmem %s94_s15, 128  ;;  %p170_p12 = scmp.lt.s32.totalorder %s94_s15, %s94_s15 }
  0x26   :  { %v41_v3 = vmul.f32 %v40_v1, %v38_v0  ;;  %v59_v4 = vstv %s121_s9  ;;  %v47_v8 = vstv %s119_s8  ;;  %p166_p11 = scmp.ne.s32.totalorder %s94_s15, %s165_s16  ;;  %p171_p13 = scmp.lt.s32.totalorder %s165_s16, %s165_s16 }
  0x27   :  { %v60_v6 = vmul.f32 %v59_v4, %v38_v0  ;;  %v62_v7 = vstv %s122_s10  ;;  %v66_v11 = vstv %s123_s11 }
  0x28   :  { %v44_v5 = vadd.f32 %v43_v2, %v41_v3  ;;  %v51_v14 = vstv %s50_s12  ;;  %v55_v20 = vstv %s120_s1  ;;  %p172_p0 = por %p171_p13, %p170_p12 }
  0x29   :  { %v63_v10 = vadd.f32 %v62_v7, %v60_v6  ;;  %v70_v17 = vstv %s124_s13 }
  0x2a   :  { %v45_v9 = vmul.f32 %v44_v5, %v38_v0  ;;  %p173_p1 = pnand %p172_p0, %p166_p11 }
  0x2b   :  { %v64_v13 = vmul.f32 %v63_v10, %v38_v0 }
  0x2c   :  { %v48_v12 = vadd.f32 %v47_v8, %v45_v9 }
  0x2d   :  { %v67_v16 = vadd.f32 %v66_v11, %v64_v13 }
  0x2e   :  { %v49_v15 = vmul.f32 %v48_v12, %v38_v0 }
  0x2f   :  { %v68_v19 = vmul.f32 %v67_v16, %v38_v0 }
  0x30   :  { %v52_v18 = vadd.f32 %v51_v14, %v49_v15 }
  0x31   :  { %v71_v22 = vadd.f32 %v70_v17, %v68_v19 }
  0x32   :  { %v53_v21 = vmul.f32 %v52_v18, %v38_v0 }
  0x33   :  { %v73_v24 = vmin.f32 %v71_v22, 20.0 }
  0x34   :  { %v56_v23 = vadd.f32 %v55_v20, %v53_v21 }
  0x35   :  { %v74_v25 = vmul.f32 1.442695, %v73_v24 }
  0x36   :  { %57 = vst [vmem:[#allocation7] sm:$0xff] %v56_v23 }
  0x37   :  { %176 = shalt.err (!%p173_p1)
}
  0x38   :  { %s177_s19 = scalar_lea.hbm %s291_s2, 128 }
  0x39   :  { %p178_p2 = scmp.ne.s32.totalorder %s291_s2, %s177_s19  ;;  %p181_p3 = scmp.lt.u32.totalorder %s177_s19, %s291_s2 }
  0x3b   :  { %p183_p4 = pnand %p181_p3, %p178_p2 }
  0x3d   :  { %186 = shalt.err (!%p183_p4)
}
  0x3e   :  { %96 = dma.vmem_to_hbm [thread:$0]  %s94_s15, 128, %s291_s2, [#allocation4]   ;;  %129 = vpow2.f32 %v74_v25  ;;  %vm72_vm1 = vcmp.gt.f32.partialorder %v71_v22, 20.0 }
  0x3f   :  { %s220_s26 = smov [#allocation8]  }
  0x40   :  { %s103_s27 = sshll.u32 %s220_s26, 4  ;;  %s104_s27 = int_to_ptr.vmem [resolvable:$true] %s103_s27 }
  0x41   :  { %s187_s28 = scalar_lea.vmem %s104_s27, 128  ;;  %p192_p6 = scmp.lt.s32.totalorder %s104_s27, %s104_s27 }
  0x42   :  { %p188_p5 = scmp.ne.s32.totalorder %s104_s27, %s187_s28  ;;  %p193_p7 = scmp.lt.s32.totalorder %s187_s28, %s187_s28 }
  0x44   :  { %p194_p8 = por %p193_p7, %p192_p6 }
  0x46   :  { %p195_p9 = pnand %p194_p8, %p188_p5 }
  0x48   :  { %v130_v26 = vpop.eup %129 }
  0x49   :  { %v76_v27 = vadd.f32 1.0, %v130_v26  ;;  %v79_v28 = vmul.f32 -0.5, %v130_v26  ;;  %v82_v30 = vand.u32 2147483647, %v130_v26 }
  0x4b   :  { %131 = vlog2.f32 %v76_v27  ;;  %v80_v29 = vadd.f32 1.0, %v79_v28  ;;  %vm83_vm0 = vcmp.lt.f32.partialorder %v82_v30, 0.0004427343 }
  0x4d   :  { %v81_v31 = vmul.f32 %v130_v26, %v80_v29 }
  0x55   :  { %v132_v32 = vpop.eup %131 }
  0x56   :  { %v78_v33 = vmul.f32 0.6931472, %v132_v32 }
  0x58   :  { %v84_v34 = vsel %vm83_vm0, %v81_v31, %v78_v33 }
  0x59   :  { %v85_v35 = vsel %vm72_vm1, %v71_v22, %v84_v34 }
  0x5a   :  { %86 = vst [vmem:[#allocation8] sm:$0xff] %v85_v35 }
  0x5b   :  { %198 = shalt.err (!%p195_p9)
}
  0x5c   :  { %s199_s30 = scalar_lea.hbm %s292_s3, 128 }
  0x5d   :  { %p200_p10 = scmp.ne.s32.totalorder %s292_s3, %s199_s30  ;;  %p203_p11 = scmp.lt.u32.totalorder %s199_s30, %s292_s3 }
  0x5f   :  { %p205_p12 = pnand %p203_p11, %p200_p10 }
  0x61   :  { %208 = shalt.err (!%p205_p12)
}
  0x62   :  { %106 = dma.vmem_to_hbm [thread:$0]  %s104_s27, 128, %s292_s3, [#allocation9]  }
  0x63   :  { %213 = dma.done.wait [#allocation4], 128  }
  0x64   :  { %214 = vsyncadd [#allocation4], 4294967168 }
  0x65   :  { %215 = dma.done.wait [#allocation9], 128  }
  0x66   :  { %216 = vsyncadd [#allocation9], 4294967168 }
  0x67   :  { %113 = vsyncpa [#allocation3], 1 }
  0x68   :  { %114 = vsyncpa [#allocation4], 1 }
  0x69   :  { %115 = vsyncpa [#allocation9], 1 }
  0x6a   :  { %116 = vsyncpa [#allocation5], 1 }

</bundles_post_ra>
